<compile_context>
chip_gen: v5e
topology: v5e:2x2
jax: 0.10.0
libtpu: 0.0.40
codegen_flags: <defaults>
</compile_context>

<pallas_src>
import functools

import jax
import jax.numpy as jnp
from jax.experimental import pallas as pl
from jax.experimental.pallas import tpu as pltpu


def gcn_kernel(x_ref, w1b_ref, b1_ref, w2_ref, o_ref):
    # x_ref:   (S, B*N)     f32   activations, batch packed along lanes
    # w1b_ref: (B*N, B*N)   bf16  block-diag( w1.T ) -- conv1, pre-transposed
    # b1_ref:  (1, B*N)     f32   conv1 bias, tiled per batch block
    # w2_ref:  (S, S)       bf16  conv2 weight (out_state, in_state)
    x = x_ref[...]                                        # f32 (S, B*N)

    # conv1 over the node axis (block-diagonal over packed batches) -> MXU.
    h = jnp.dot(x.astype(jnp.bfloat16), w1b_ref[...],
                preferred_element_type=jnp.float32)

    # bias + residual + ReLU, all in f32 on the VPU.
    h = jnp.maximum(h + b1_ref[...] + x, 0.0)

    # conv2 over the state axis -> MXU.
    out = jnp.dot(w2_ref[...], h.astype(jnp.bfloat16),
                  preferred_element_type=jnp.float32)
    o_ref[...] = out.astype(o_ref.dtype)


@functools.partial(jax.jit, static_argnames=())
def gcn_forward(x, w1, b1, w2):
    B, S, N = x.shape
    L = B * N  # packed lane width (128 for B=2, N=64)

    # ---- layout plumbing on the XLA side (cheap, keeps the kernel lane-dense)
    # Pack batch along the last (lane) axis: (B, S, N) -> (S, B*N).
    x_packed = jnp.transpose(x, (1, 0, 2)).reshape(S, L).astype(jnp.float32)
    # Pre-transposed, block-diagonal conv1 weight so the node contraction works
    # directly on packed lanes: block[b*N + j, b*N + n] = w1[n, j].
    w1t_block = jnp.kron(jnp.eye(B, dtype=w1.dtype), w1.T).astype(jnp.bfloat16)
    b1_packed = jnp.tile(b1, B).reshape(1, L).astype(jnp.float32)
    w2_bf16 = w2.astype(jnp.bfloat16)

    flops = 2 * B * S * N * N + 2 * B * S * S * N
    bytes_accessed = (x_packed.size * 4 + S * L * 4
                      + w1t_block.size * 2 + b1_packed.size * 4
                      + w2_bf16.size * 2)

    out_packed = pl.pallas_call(
        gcn_kernel,
        out_shape=jax.ShapeDtypeStruct((S, L), jnp.float32),
        grid=(1,),  # single step: whole batch at once (no per-batch overhead)
        in_specs=[
            pl.BlockSpec((S, L), lambda i: (0, 0)),
            pl.BlockSpec((L, L), lambda i: (0, 0)),
            pl.BlockSpec((1, L), lambda i: (0, 0)),
            pl.BlockSpec((S, S), lambda i: (0, 0)),
        ],
        out_specs=pl.BlockSpec((S, L), lambda i: (0, 0)),
        compiler_params=pltpu.CompilerParams(
            dimension_semantics=("arbitrary",)),
        cost_estimate=pl.CostEstimate(
            flops=flops, transcendentals=0, bytes_accessed=bytes_accessed),
    )(x_packed, w1t_block, b1_packed, w2_bf16)

    # Unpack: (S, B*N) -> (B, S, N).
    return jnp.transpose(out_packed.reshape(S, B, N), (1, 0, 2)).astype(x.dtype)


def gcn_reference(x, w1, b1, w2):
    # Pure-JAX f32 reference mirroring the PyTorch forward.
    h = jnp.einsum("bsj,nj->bsn", x, w1) + b1[None, None, :]
    h = jnp.maximum(h + x, 0.0)
    return jnp.einsum("ts,bsn->btn", w2, h)


if __name__ == "__main__":
    B, num_state, num_node = 2, 32, 64

    key = jax.random.PRNGKey(0)
    kx, kw1, kb1, kw2 = jax.random.split(key, 4)

    # Deterministic synthetic parameters (Conv1d k=1 weights are (out, in)).
    x = jax.random.normal(kx, (B, num_state, num_node), dtype=jnp.float32)
    w1 = jax.random.normal(kw1, (num_node, num_node), dtype=jnp.float32) * 0.1
    b1 = jax.random.normal(kb1, (num_node,), dtype=jnp.float32) * 0.1
    w2 = jax.random.normal(kw2, (num_state, num_state), dtype=jnp.float32) * 0.1

    out = gcn_forward(x, w1, b1, w2)
    out = jax.block_until_ready(out)

    ref = gcn_reference(x, w1, b1, w2)
    assert out.shape == (B, num_state, num_node)
    # bf16 MXU operands vs f32 reference -> loosened tolerance.
    assert jnp.allclose(out, ref, atol=5e-2, rtol=5e-2), "mismatch vs reference"

    print("KERNEL_OK")
</pallas_src>

<mosaic_0001>
module attributes {stable_mosaic.version = 11 : i64} {
  func.func @gcn_kernel(%arg0: i32, %arg1: memref<32x128xf32, #tpu.memory_space<vmem>>, %arg2: memref<128x128xbf16, #tpu.memory_space<vmem>>, %arg3: memref<1x128xf32, #tpu.memory_space<vmem>>, %arg4: memref<32x32xbf16, #tpu.memory_space<vmem>>, %arg5: memref<32x128xf32, #tpu.memory_space<vmem>>) attributes {dimension_semantics = [#tpu.dimension_semantics<arbitrary>], iteration_bounds = array<i64: 1>, scalar_prefetch = 0 : i64, scratch_operands = 0 : i64, tpu.core_type = #tpu.core_type<tc>, window_params = [{pipeline_mode = #tpu.pipeline_mode<synchronous>, transform_indices = @transform_0, window_bounds = array<i64: 32, 128>}, {pipeline_mode = #tpu.pipeline_mode<synchronous>, transform_indices = @transform_1, window_bounds = array<i64: 128, 128>}, {pipeline_mode = #tpu.pipeline_mode<synchronous>, transform_indices = @transform_2, window_bounds = array<i64: 1, 128>}, {pipeline_mode = #tpu.pipeline_mode<synchronous>, transform_indices = @transform_3, window_bounds = array<i64: 32, 32>}, {pipeline_mode = #tpu.pipeline_mode<synchronous>, transform_indices = @transform_4, window_bounds = array<i64: 32, 128>}]} {
    %c0 = arith.constant 0 : index
    %c0_0 = arith.constant 0 : index
    %0 = vector.load %arg1[%c0, %c0_0] : memref<32x128xf32, #tpu.memory_space<vmem>>, vector<32x128xf32>
    %1 = arith.truncf %0 : vector<32x128xf32> to vector<32x128xbf16>
    %c0_1 = arith.constant 0 : index
    %c0_2 = arith.constant 0 : index
    %2 = vector.load %arg2[%c0_1, %c0_2] : memref<128x128xbf16, #tpu.memory_space<vmem>>, vector<128x128xbf16>
    %cst = arith.constant dense<0.000000e+00> : vector<32x128xf32>
    %3 = tpu.matmul %1, %2, %cst {dimension_numbers = #tpu.dot_dimension_numbers<[1], [0], [0], [1], [0, 0, 1, 1], [], []>} : vector<32x128xbf16>, vector<128x128xbf16>, vector<32x128xf32> -> vector<32x128xf32>
    %c0_3 = arith.constant 0 : index
    %c0_4 = arith.constant 0 : index
    %4 = vector.load %arg3[%c0_3, %c0_4] : memref<1x128xf32, #tpu.memory_space<vmem>>, vector<1x128xf32>
    %5 = vector.broadcast %4 : vector<1x128xf32> to vector<32x128xf32>
    %6 = arith.addf %3, %5 : vector<32x128xf32>
    %7 = arith.addf %6, %0 : vector<32x128xf32>
    %cst_5 = arith.constant 0.000000e+00 : f32
    %8 = vector.broadcast %cst_5 : f32 to vector<32x128xf32>
    %9 = arith.maximumf %7, %8 : vector<32x128xf32>
    %c0_6 = arith.constant 0 : index
    %c0_7 = arith.constant 0 : index
    %10 = vector.load %arg4[%c0_6, %c0_7] : memref<32x32xbf16, #tpu.memory_space<vmem>>, vector<32x32xbf16>
    %11 = arith.truncf %9 : vector<32x128xf32> to vector<32x128xbf16>
    %cst_8 = arith.constant dense<0.000000e+00> : vector<32x128xf32>
    %12 = tpu.matmul %10, %11, %cst_8 {dimension_numbers = #tpu.dot_dimension_numbers<[1], [0], [0], [1], [0, 0, 1, 1], [], []>} : vector<32x32xbf16>, vector<32x128xbf16>, vector<32x128xf32> -> vector<32x128xf32>
    %c0_9 = arith.constant 0 : index
    %c0_10 = arith.constant 0 : index
    %13 = vector.load %arg5[%c0_9, %c0_10] : memref<32x128xf32, #tpu.memory_space<vmem>>, vector<32x128xf32>
    tpu.vector_store %arg5[%c0_9, %c0_10], %12 {strides = array<i32>} : memref<32x128xf32, #tpu.memory_space<vmem>>, vector<32x128xf32>,
    return
  }
  func.func @transform_0(%arg0: i32) -> (i32, i32) {
    %c0_i32 = arith.constant 0 : i32
    %c0_i32_0 = arith.constant 0 : i32
    %c0_i32_1 = arith.constant 0 : i32
    return %c0_i32, %c0_i32_0 : i32, i32
  }
  func.func @transform_1(%arg0: i32) -> (i32, i32) {
    %c0_i32 = arith.constant 0 : i32
    %c0_i32_0 = arith.constant 0 : i32
    %c0_i32_1 = arith.constant 0 : i32
    return %c0_i32, %c0_i32_0 : i32, i32
  }
  func.func @transform_2(%arg0: i32) -> (i32, i32) {
    %c0_i32 = arith.constant 0 : i32
    %c0_i32_0 = arith.constant 0 : i32
    %c0_i32_1 = arith.constant 0 : i32
    return %c0_i32, %c0_i32_0 : i32, i32
  }
  func.func @transform_3(%arg0: i32) -> (i32, i32) {
    %c0_i32 = arith.constant 0 : i32
    %c0_i32_0 = arith.constant 0 : i32
    %c0_i32_1 = arith.constant 0 : i32
    return %c0_i32, %c0_i32_0 : i32, i32
  }
  func.func @transform_4(%arg0: i32) -> (i32, i32) {
    %c0_i32 = arith.constant 0 : i32
    %c0_i32_0 = arith.constant 0 : i32
    %c0_i32_1 = arith.constant 0 : i32
    return %c0_i32, %c0_i32_0 : i32, i32
  }
}

</mosaic_0001>

<bundles_post_ra>
// kernel: tile.8
= control target key start
LH: loop header
LB: loop body
LE: loop exit
PB: predicated region body
PF: predicated region fallthrough
CT: control target
= control target key end

     0   :  { %s22_s0 = inlined_call_operand.vmem [shape: f32[64], index: 0, kind: input, shape index: {}]   ;;  %s23_s1 = inlined_call_operand.vmem [shape: f32[2,64], index: 1, kind: output, shape index: {}]  }
   0x1   :  { %v4_v0 = vld [vmem:[%s22_s0] ss:$0 sm:$0xff] }
   0x2   :  { %5 = vst [vmem:[%s23_s1] sm:$0x3] %v4_v0 }

// kernel: tile.9
= control target key start
LH: loop header
LB: loop body
LE: loop exit
PB: predicated region body
PF: predicated region fallthrough
CT: control target
= control target key end

     0   :  { %vm7_vm0 = vcmask 523264   ;;  %vm13_vm1 = vcmask 1048064   ;;  %s39_s0 = inlined_call_operand.vmem [shape: f32[2,64], index: 0, kind: input, shape index: {}]   ;;  %s40_s1 = inlined_call_operand.vmem [shape: f32[1,128], index: 1, kind: output, shape index: {}]  }
   0x1   :  { %v4_v0 = vld [vmem:[%s39_s0] sm:$0x3]  ;;  %s22_s0 = smov 64  }
   0x2   :  { %5 = vst [vmem:[#allocation1] sm:$0x3] %v4_v0 }
   0x9   :  { %v10_v1 = vld [vmem:[#allocation1 + $0x1] sm:$0x1]   ;;  %v6_v2 = vld [vmem:[#allocation1] sm:$0x1]  }
   0xa   :  { %11 = vrot.lane.b32.xlu0 %v10_v1, %s22_s0  ;;  %8 = vst.msk [vmem:[#allocation0] sm:$0x1] %vm7_vm0, %v6_v2  }
  0x7c   :  { %v12_v3 = vpop.permute.xlu0 %11  }
  0x7d   :  { %14 = vst.msk [vmem:[#allocation0] sm:$0x1] %vm13_vm1, %v12_v3  }
  0x84   :  { %v17_v4 = vld [vmem:[#allocation0] sm:$0x1] }
  0x85   :  { %20 = vst [vmem:[%s40_s1] sm:$0x1] %v17_v4 }

// kernel: gcn_forward.1
= control target key start
LH: loop header
LB: loop body
LE: loop exit
PB: predicated region body
PF: predicated region fallthrough
CT: control target
= control target key end

     0   :  { %vm135_vm0 = vcmask 261120   ;;  %s312_s1 = inlined_call_operand.vmem [shape: bf16[128,128], index: 1, kind: input, shape index: {}]   ;;  %s313_s2 = inlined_call_operand.vmem [shape: f32[1,128], index: 2, kind: input, shape index: {}]   ;;  %s314_s0 = inlined_call_operand.vmem [shape: f32[32,128], index: 0, kind: input, shape index: {}]   ;;  %s315_s3 = inlined_call_operand.vmem [shape: bf16[32,32], index: 3, kind: input, shape index: {}]   ;;  %s316_s4 = inlined_call_operand.vmem [shape: f32[32,128], index: 4, kind: output, shape index: {}]  }
   0x1   :  { %v218_v0 = vld [vmem:[%s312_s1 + $0x38] sm:$0xff]  ;;  %v217_v1 = vld [vmem:[%s312_s1 + $0x30] sm:$0xff]  ;;  %v216_v2 = vld [vmem:[%s312_s1 + $0x28] sm:$0xff] }
   0x2   :  { %221 = vmatpush.bf16.msra.mxu2 %v218_v0  ;;  %92 = vmatpush.bf16.msra.mxu0 %v218_v0  ;;  %v215_v3 = vld [vmem:[%s312_s1 + $0x20] sm:$0xff]  ;;  %v214_v4 = vld [vmem:[%s312_s1 + $0x18] sm:$0xff]  ;;  %v213_v5 = vld [vmem:[%s312_s1 + $0x10] sm:$0xff] }
   0x3   :  { %v212_v6 = vld [vmem:[%s312_s1 + $0x8] sm:$0xff]  ;;  %v211_v7 = vld [vmem:[%s312_s1] sm:$0xff]  ;;  %v20_v8 = vld [vmem:[%s314_s0 + $0x10] sm:$0xff] }
   0x4   :  { %v21_v9 = vld [vmem:[%s314_s0 + $0x18] sm:$0xff]  ;;  %v18_v10 = vld [vmem:[%s314_s0] sm:$0xff]  ;;  %v19_v11 = vld [vmem:[%s314_s0 + $0x8] sm:$0xff] }
   0x5   :  { %v23_v12 = vpack.c.bf16 %v21_v9, %v20_v8  ;;  %v22_v13 = vpack.c.bf16 %v19_v11, %v18_v10  ;;  %v229_v16 = vld [vmem:[%s313_s2] ss:$0 sm:$0xff]  ;;  %v220_v34 = vld [vmem:[%s315_s3 + $0x8] sm:$0xff] }
   0x6   :  { %222 = vmatpush.bf16.msra.mxu2 %v217_v1  ;;  %93 = vmatpush.bf16.msra.mxu0 %v217_v1  ;;  %v219_v33 = vld [vmem:[%s315_s3] sm:$0xff] }
   0xa   :  { %223 = vmatpush.bf16.msra.mxu2 %v216_v2  ;;  %94 = vmatpush.bf16.msra.mxu0 %v216_v2 }
   0xe   :  { %224 = vmatpush.bf16.msra.mxu2 %v215_v3  ;;  %95 = vmatpush.bf16.msra.mxu0 %v215_v3 }
  0x12   :  { %225 = vmatpush.bf16.msra.mxu2 %v214_v4  ;;  %96 = vmatpush.bf16.msra.mxu0 %v214_v4 }
  0x16   :  { %226 = vmatpush.bf16.msra.mxu2 %v213_v5  ;;  %97 = vmatpush.bf16.msra.mxu0 %v213_v5 }
  0x1a   :  { %227 = vmatpush.bf16.msra.mxu2 %v212_v6  ;;  %98 = vmatpush.bf16.msra.mxu0 %v212_v6 }
  0x1e   :  { %228 = vmatpush.bf16.msra.mxu2 %v211_v7  ;;  %99 = vmatpush.bf16.msra.mxu0 %v211_v7 }
  0x21   :  { %105 = vmatmul.bf16.vlgmr.msra.gmra.mxu2 %v23_v12  ;;  %100 = vmatmul.bf16.vlgmr.msra.gmra.mxu0 %v22_v13 }
  0x9e   :  { %v101_v14 = vpop.f32.mrf.mxu0 }
  0x9f   :  { %v102_v19 = vadd.f32 %v229_v16, %v101_v14 }
  0xa1   :  { %v111_v24 = vadd.f32 %v102_v19, %v18_v10 }
  0xa3   :  { %v115_v29 = vmax.f32 %v111_v24, 0.0 }
  0xa4   :  { %v106_v15 = vpop.f32.mrf.mxu2 }
  0xa5   :  { %v107_v18 = vadd.f32 %v229_v16, %v106_v15 }
  0xa6   :  { %v103_v17 = vpop.f32.mrf.mxu0 }
  0xa7   :  { %v104_v20 = vadd.f32 %v229_v16, %v103_v17  ;;  %v113_v23 = vadd.f32 %v107_v18, %v20_v8 }
  0xa9   :  { %v112_v25 = vadd.f32 %v104_v20, %v19_v11  ;;  %v117_v27 = vmax.f32 %v113_v23, 0.0 }
  0xab   :  { %v116_v30 = vmax.f32 %v112_v25, 0.0 }
  0xac   :  { %v108_v21 = vpop.f32.mrf.mxu2 }
  0xad   :  { %v109_v22 = vadd.f32 %v229_v16, %v108_v21  ;;  %v123_v32 = vpack.c.bf16 %v116_v30, %v115_v29 }
  0xaf   :  { %v114_v26 = vadd.f32 %v109_v22, %v21_v9 }
  0xb1   :  { %v118_v28 = vmax.f32 %v114_v26, 0.0 }
  0xb3   :  { %v124_v31 = vpack.c.bf16 %v118_v28, %v117_v27 }
  0xb5   :  { %148 = vmatpush.bf16.msra.mxu1 %v124_v31 }
  0xb9   :  { %149 = vmatpush.bf16.msra.mxu1 %v123_v32 }
  0xbc   :  { %209 = vmatmul.msk.bf16.vlgmr.msra.gmra.mxu1 %vm135_vm0, %v219_v33 }
  0xcc   :  { %210 = vmatmul.msk.bf16.gmra.mxu1 %vm135_vm0, %v220_v34 }
 0x139   :  { %v151_v35 = vpop.f32.mrf.mxu1 }
 0x13a   :  { %161 = vst [vmem:[%s316_s4] sm:$0xff] %v151_v35 }
 0x141   :  { %v153_v36 = vpop.f32.mrf.mxu1 }
 0x142   :  { %162 = vst [vmem:[%s316_s4 + $0x8] sm:$0xff] %v153_v36 }
 0x149   :  { %v156_v37 = vpop.f32.mrf.mxu1 }
 0x14a   :  { %163 = vst [vmem:[%s316_s4 + $0x10] sm:$0xff] %v156_v37 }
 0x151   :  { %v158_v38 = vpop.f32.mrf.mxu1 }
 0x152   :  { %164 = vst [vmem:[%s316_s4 + $0x18] sm:$0xff] %v158_v38 }

</bundles_post_ra>
